<compile_context>
chip_gen: v7x
topology: tpu7x:2x2x1
jax: 0.10.0
libtpu: 0.0.40
codegen_flags: <defaults>
</compile_context>

<pallas_src>
import jax
import jax.numpy as jnp
from jax.experimental import pallas as pl
from jax.experimental.pallas import tpu as pltpu


def _round_up(n, m):
    return (n + m - 1) // m * m


def _deepset_sum_kernel(x_ref, s_ref, w_ref, b_ref, o_ref):
    # x_ref: (TB, K*L)  lane-dense input tile (streamed over the batch)
    # s_ref: (K*L, K)   bf16 block-selector ones matrix (resident)
    # w_ref, b_ref: (1, K) f32 parameters (resident)
    # o_ref: (TB, K)
    s = s_ref[...]
    x = x_ref[...]
    if x.dtype == jnp.bfloat16:
        # bf16 is MXU-native: one pass, f32 accumulation, exact (selector is 0/1).
        sums = jnp.dot(x, s, preferred_element_type=jnp.float32)
    else:
        # Exact f32 reduction via 3-way bf16 split: x == x1 + x2 + x3 exactly,
        # selector entries are exactly representable in bf16, each dot
        # accumulates in f32 -> matches jnp.sum(x, -1) to f32 precision with
        # only 3 DEFAULT-precision MXU passes (vs 6 for precision=HIGHEST).
        xf = x.astype(jnp.float32)
        x1 = xf.astype(jnp.bfloat16)
        r1 = xf - x1.astype(jnp.float32)
        x2 = r1.astype(jnp.bfloat16)
        x3 = (r1 - x2.astype(jnp.float32)).astype(jnp.bfloat16)
        sums = (
            jnp.dot(x1, s, preferred_element_type=jnp.float32)
            + jnp.dot(x2, s, preferred_element_type=jnp.float32)
            + jnp.dot(x3, s, preferred_element_type=jnp.float32)
        )  # (TB, K)
    out = sums * w_ref[...] + b_ref[...]  # (1, K) broadcasts over TB
    o_ref[...] = out.astype(o_ref.dtype)


def deepset_sum(x, weight, bias, *, batch_tile=None):
    """DeepSetSum forward: out = x.sum(-1) * weight + bias.

    x: (B, K, L); weight, bias: (K,). Returns (B, K) in x.dtype.
    """
    B, K, L = x.shape
    KL = K * L
    itemsize = jnp.dtype(x.dtype).itemsize
    needs_split = x.dtype != jnp.bfloat16

    # Resident bf16 selector scales as K*K*L; guard it.
    sel_bytes = KL * K * 2
    if sel_bytes > (8 << 20):
        # TODO(synk): tile the selector (and the dot) over K for very large in_blocks.
        raise ValueError("block-selector too large to keep resident in VMEM")

    # ---- batch tile: sized by BYTES -----------------------------------------
    # f32 path carries split intermediates (~3.5x the tile) -> ~4 MiB input tile;
    # bf16 path is pure streaming -> ~8 MiB input tile.
    if batch_tile is None:
        target_bytes = (4 << 20) if needs_split else (8 << 20)
        tb = max(8, (target_bytes // max(KL * itemsize, 1)) // 8 * 8)
        # Keep >= 2 grid steps where possible so v7x can shard across its 2 TCs.
        tb = min(tb, max(8, _round_up(pl.cdiv(B, 2), 8)))
    else:
        tb = max(8, (int(batch_tile) // 8) * 8)
    if B < tb:
        tb = B  # block shape equal to the full array dim is always legal

    num_tiles = pl.cdiv(B, tb)  # ragged last block handled by Pallas (no jnp.pad)

    # ---- lane-dense layout (wrapper-side, free) -----------------------------
    x2d = x.reshape(B, KL)  # contiguous reshape; x read from HBM exactly once

    # selector[r, k] = 1.0 iff r // L == k   -> x2d @ selector == x.sum(-1)
    selector = (
        (jnp.arange(KL, dtype=jnp.int32)[:, None] // L)
        == jnp.arange(K, dtype=jnp.int32)[None, :]
    ).astype(jnp.bfloat16)

    w2 = weight.reshape(1, K).astype(jnp.float32)
    b2 = bias.reshape(1, K).astype(jnp.float32)

    # ---- VMEM budget ---------------------------------------------------------
    in_tile_bytes = tb * KL * itemsize
    split_tmp_bytes = 14 * tb * KL if needs_split else 0  # x1..x3 bf16 + r1/r2 f32
    vmem_budget = (
        2 * in_tile_bytes            # double-buffered input
        + split_tmp_bytes            # in-kernel split intermediates
        + 2 * sel_bytes              # resident selector (+ slack)
        + 2 * tb * K * itemsize      # double-buffered output
        + (2 << 20)                  # margin
    )
    # >= v6e/v7x scoped default, raises v5e's 16 MiB default, <= v7x 64 MiB physical.
    vmem_limit = int(min(max(vmem_budget, 32 << 20), 48 << 20))

    npass = 3 if needs_split else 1
    cost = pl.CostEstimate(
        flops=2 * B * KL * K * npass + 2 * B * K,
        transcendentals=0,
        bytes_accessed=B * KL * itemsize + sel_bytes + 2 * K * 4 + B * K * itemsize,
    )

    return pl.pallas_call(
        _deepset_sum_kernel,
        out_shape=jax.ShapeDtypeStruct((B, K), x.dtype),
        grid_spec=pl.GridSpec(
            grid=(num_tiles,),
            in_specs=[
                pl.BlockSpec((tb, KL), lambda i: (i, 0)),  # streamed over B
                pl.BlockSpec((KL, K), lambda i: (0, 0)),   # resident selector
                pl.BlockSpec((1, K), lambda i: (0, 0)),    # resident weight
                pl.BlockSpec((1, K), lambda i: (0, 0)),    # resident bias
            ],
            out_specs=pl.BlockSpec((tb, K), lambda i: (i, 0)),
        ),
        compiler_params=pltpu.CompilerParams(
            dimension_semantics=("parallel",),  # shards batch grid over v7x's 2 TCs
            vmem_limit_bytes=vmem_limit,
        ),
        cost_estimate=cost,
    )(x2d, selector, w2, b2)


if __name__ == "__main__":
    # Small shapes consistent with the forward: x = (batch, in_blocks, seq)
    B, in_blocks, L = 4, 32, 16

    key = jax.random.PRNGKey(0)
    kx, kw, kb = jax.random.split(key, 3)

    # Parameter init matching the PyTorch module: uniform on [-lim, lim]
    lim = in_blocks ** (-0.5) / 2
    weight = jax.random.uniform(kw, (in_blocks,), jnp.float32, -lim, lim)
    bias = jax.random.uniform(kb, (in_blocks,), jnp.float32, -lim, lim)

    x = jax.random.normal(kx, (B, in_blocks, L), jnp.float32)

    out = deepset_sum(x, weight, bias)
    jax.block_until_ready(out)

    # Reference (plain JAX) check of the PyTorch semantics.
    ref = jnp.sum(x, axis=-1) * weight + bias
    assert out.shape == (B, in_blocks)
    assert jnp.allclose(out, ref, atol=1e-5, rtol=1e-5), "mismatch vs reference"

    print("KERNEL_OK")
</pallas_src>

<mosaic_0001>
module attributes {stable_mosaic.version = 11 : i64} {
  func.func @_deepset_sum_kernel(%arg0: i32, %arg1: memref<4x512xf32, #tpu.memory_space<vmem>>, %arg2: memref<512x32xbf16, #tpu.memory_space<vmem>>, %arg3: memref<1x32xf32, #tpu.memory_space<vmem>>, %arg4: memref<1x32xf32, #tpu.memory_space<vmem>>, %arg5: memref<4x32xf32, #tpu.memory_space<vmem>>) attributes {dimension_semantics = [#tpu.dimension_semantics<parallel>], iteration_bounds = array<i64: 1>, scalar_prefetch = 0 : i64, scratch_operands = 0 : i64, tpu.core_type = #tpu.core_type<tc>, window_params = [{transform_indices = @transform_0, window_bounds = array<i64: 4, 512>}, {pipeline_mode = #tpu.pipeline_mode<synchronous>, transform_indices = @transform_1, window_bounds = array<i64: 512, 32>}, {pipeline_mode = #tpu.pipeline_mode<synchronous>, transform_indices = @transform_2, window_bounds = array<i64: 1, 32>}, {pipeline_mode = #tpu.pipeline_mode<synchronous>, transform_indices = @transform_3, window_bounds = array<i64: 1, 32>}, {transform_indices = @transform_4, window_bounds = array<i64: 4, 32>}]} {
    %c0 = arith.constant 0 : index
    %c0_0 = arith.constant 0 : index
    %0 = vector.load %arg2[%c0, %c0_0] : memref<512x32xbf16, #tpu.memory_space<vmem>>, vector<512x32xbf16>
    %c0_1 = arith.constant 0 : index
    %c0_2 = arith.constant 0 : index
    %1 = vector.load %arg1[%c0_1, %c0_2] : memref<4x512xf32, #tpu.memory_space<vmem>>, vector<4x512xf32>
    %2 = arith.truncf %1 : vector<4x512xf32> to vector<4x512xbf16>
    %3 = arith.extf %2 : vector<4x512xbf16> to vector<4x512xf32>
    %4 = arith.subf %1, %3 : vector<4x512xf32>
    %5 = arith.truncf %4 : vector<4x512xf32> to vector<4x512xbf16>
    %6 = arith.extf %5 : vector<4x512xbf16> to vector<4x512xf32>
    %7 = arith.subf %4, %6 : vector<4x512xf32>
    %8 = arith.truncf %7 : vector<4x512xf32> to vector<4x512xbf16>
    %cst = arith.constant dense<0.000000e+00> : vector<4x32xf32>
    %9 = tpu.matmul %2, %0, %cst {dimension_numbers = #tpu.dot_dimension_numbers<[1], [0], [0], [1], [0, 0, 1, 1], [], []>} : vector<4x512xbf16>, vector<512x32xbf16>, vector<4x32xf32> -> vector<4x32xf32>
    %cst_3 = arith.constant dense<0.000000e+00> : vector<4x32xf32>
    %10 = tpu.matmul %5, %0, %cst_3 {dimension_numbers = #tpu.dot_dimension_numbers<[1], [0], [0], [1], [0, 0, 1, 1], [], []>} : vector<4x512xbf16>, vector<512x32xbf16>, vector<4x32xf32> -> vector<4x32xf32>
    %11 = arith.addf %9, %10 : vector<4x32xf32>
    %cst_4 = arith.constant dense<0.000000e+00> : vector<4x32xf32>
    %12 = tpu.matmul %8, %0, %cst_4 {dimension_numbers = #tpu.dot_dimension_numbers<[1], [0], [0], [1], [0, 0, 1, 1], [], []>} : vector<4x512xbf16>, vector<512x32xbf16>, vector<4x32xf32> -> vector<4x32xf32>
    %13 = arith.addf %11, %12 : vector<4x32xf32>
    %c0_5 = arith.constant 0 : index
    %c0_6 = arith.constant 0 : index
    %14 = vector.load %arg3[%c0_5, %c0_6] : memref<1x32xf32, #tpu.memory_space<vmem>>, vector<1x32xf32>
    %15 = vector.broadcast %14 : vector<1x32xf32> to vector<4x32xf32>
    %16 = arith.mulf %13, %15 : vector<4x32xf32>
    %c0_7 = arith.constant 0 : index
    %c0_8 = arith.constant 0 : index
    %17 = vector.load %arg4[%c0_7, %c0_8] : memref<1x32xf32, #tpu.memory_space<vmem>>, vector<1x32xf32>
    %18 = vector.broadcast %17 : vector<1x32xf32> to vector<4x32xf32>
    %19 = arith.addf %16, %18 : vector<4x32xf32>
    %c0_9 = arith.constant 0 : index
    %c0_10 = arith.constant 0 : index
    %20 = vector.load %arg5[%c0_9, %c0_10] : memref<4x32xf32, #tpu.memory_space<vmem>>, vector<4x32xf32>
    tpu.vector_store %arg5[%c0_9, %c0_10], %19 {strides = array<i32>} : memref<4x32xf32, #tpu.memory_space<vmem>>, vector<4x32xf32>,
    return
  }
  func.func @transform_0(%arg0: i32) -> (i32, i32) {
    %c0_i32 = arith.constant 0 : i32
    %c0_i32_0 = arith.constant 0 : i32
    return %arg0, %c0_i32 : i32, i32
  }
  func.func @transform_1(%arg0: i32) -> (i32, i32) {
    %c0_i32 = arith.constant 0 : i32
    %c0_i32_0 = arith.constant 0 : i32
    %c0_i32_1 = arith.constant 0 : i32
    return %c0_i32, %c0_i32_0 : i32, i32
  }
  func.func @transform_2(%arg0: i32) -> (i32, i32) {
    %c0_i32 = arith.constant 0 : i32
    %c0_i32_0 = arith.constant 0 : i32
    %c0_i32_1 = arith.constant 0 : i32
    return %c0_i32, %c0_i32_0 : i32, i32
  }
  func.func @transform_3(%arg0: i32) -> (i32, i32) {
    %c0_i32 = arith.constant 0 : i32
    %c0_i32_0 = arith.constant 0 : i32
    %c0_i32_1 = arith.constant 0 : i32
    return %c0_i32, %c0_i32_0 : i32, i32
  }
  func.func @transform_4(%arg0: i32) -> (i32, i32) {
    %c0_i32 = arith.constant 0 : i32
    %c0_i32_0 = arith.constant 0 : i32
    return %arg0, %c0_i32 : i32, i32
  }
}

</mosaic_0001>

<bundles_post_ra>
// kernel: tpu_custom_call.1
= control target key start
LH: loop header
LB: loop body
LE: loop exit
PB: predicated region body
PF: predicated region fallthrough
CT: control target
= control target key end

     0   :  { %s1147_s0 = inlined_call_operand.vmem [shape: f32[4,512], index: 0, kind: input, shape index: {}]   ;;  %s1148_s1 = inlined_call_operand.vmem [shape: bf16[512,32], index: 1, kind: input, shape index: {}]   ;;  %s1149_s2 = inlined_call_operand.vmem [shape: f32[1,32], index: 2, kind: input, shape index: {}]   ;;  %s1150_s3 = inlined_call_operand.vmem [shape: f32[1,32], index: 3, kind: input, shape index: {}]   ;;  %s1151_s4 = inlined_call_operand.hbm [shape: f32[4,32], index: 4, kind: output, shape index: {}]  }
   0x1   :  { %v862_v0 = vld [vmem:[%s1148_s1 + $0x40] sm:$0xff]   ;;  %v885_v4 = vld [vmem:[%s1148_s1 + $0x48] sm:$0xff]   ;;  %v909_v8 = vld [vmem:[%s1148_s1 + $0x50] sm:$0xff]  }
   0x2   :  { %v867_v1 = vld [vmem:[%s1148_s1 + $0xc0] sm:$0xff]   ;;  %642 = vmatprep.subr.bf16.mxu0 %v862_v0  ;;  %v891_v5 = vld [vmem:[%s1148_s1 + $0xc8] sm:$0xff]   ;;  %v915_v9 = vld [vmem:[%s1148_s1 + $0xd0] sm:$0xff]  }
   0x3   :  { %v873_v2 = vld [vmem:[%s1148_s1] sm:$0xff]   ;;  %664 = vmatprep.subr.bf16.mxu1 %v867_v1  ;;  %v897_v6 = vld [vmem:[%s1148_s1 + $0x8] sm:$0xff]   ;;  %v921_v10 = vld [vmem:[%s1148_s1 + $0x10] sm:$0xff]  }
   0x4   :  { %v879_v3 = vld [vmem:[%s1148_s1 + $0x80] sm:$0xff]   ;;  %643 = vmatpush3.bf16.msra.mxu0 %v873_v2  ;;  %v903_v7 = vld [vmem:[%s1148_s1 + $0x88] sm:$0xff]   ;;  %v927_v11 = vld [vmem:[%s1148_s1 + $0x90] sm:$0xff]  }
   0x5   :  { %665 = vmatpush3.bf16.msra.mxu1 %v879_v3  ;;  %644 = vmatprep.subr.bf16.mxu0 %v885_v4  ;;  %v933_v12 = vld [vmem:[%s1148_s1 + $0x58] sm:$0xff]   ;;  %v957_v16 = vld [vmem:[%s1148_s1 + $0x60] sm:$0xff]   ;;  %v981_v20 = vld [vmem:[%s1148_s1 + $0x68] sm:$0xff]  }
   0x6   :  { %666 = vmatprep.subr.bf16.mxu1 %v891_v5  ;;  %v939_v13 = vld [vmem:[%s1148_s1 + $0xd8] sm:$0xff]   ;;  %v963_v17 = vld [vmem:[%s1148_s1 + $0xe0] sm:$0xff]   ;;  %v987_v21 = vld [vmem:[%s1148_s1 + $0xe8] sm:$0xff]  }
   0x7   :  { %v945_v14 = vld [vmem:[%s1148_s1 + $0x18] sm:$0xff]   ;;  %v969_v18 = vld [vmem:[%s1148_s1 + $0x20] sm:$0xff]   ;;  %v993_v22 = vld [vmem:[%s1148_s1 + $0x28] sm:$0xff]  }
   0x8   :  { %645 = vmatpush3.bf16.msra.mxu0 %v897_v6  ;;  %v951_v15 = vld [vmem:[%s1148_s1 + $0x98] sm:$0xff]   ;;  %v975_v19 = vld [vmem:[%s1148_s1 + $0xa0] sm:$0xff]   ;;  %v999_v23 = vld [vmem:[%s1148_s1 + $0xa8] sm:$0xff]  }
   0x9   :  { %667 = vmatpush3.bf16.msra.mxu1 %v903_v7  ;;  %646 = vmatprep.subr.bf16.mxu0 %v909_v8  ;;  %v1005_v24 = vld [vmem:[%s1148_s1 + $0x70] sm:$0xff]   ;;  %v1029_v28 = vld [vmem:[%s1148_s1 + $0x78] sm:$0xff]   ;;  %v83_v32 = vld [vmem:[%s1147_s0] sm:$0xff] }
   0xa   :  { %668 = vmatprep.subr.bf16.mxu1 %v915_v9  ;;  %v1011_v25 = vld [vmem:[%s1148_s1 + $0xf0] sm:$0xff]   ;;  %v1035_v29 = vld [vmem:[%s1148_s1 + $0xf8] sm:$0xff]   ;;  %v84_v33 = vld [vmem:[%s1147_s0 + $0x8] sm:$0xff] }
   0xb   :  { %v1017_v26 = vld [vmem:[%s1148_s1 + $0x30] sm:$0xff]   ;;  %v1041_v30 = vld [vmem:[%s1148_s1 + $0x38] sm:$0xff]  }
   0xc   :  { %647 = vmatpush3.bf16.msra.mxu0 %v921_v10  ;;  %v1023_v27 = vld [vmem:[%s1148_s1 + $0xb0] sm:$0xff]   ;;  %v1047_v31 = vld [vmem:[%s1148_s1 + $0xb8] sm:$0xff]  }
   0xd   :  { %669 = vmatpush3.bf16.msra.mxu1 %v927_v11  ;;  %648 = vmatprep.subr.bf16.mxu0 %v933_v12 }
   0xe   :  { %670 = vmatprep.subr.bf16.mxu1 %v939_v13 }
  0x10   :  { %649 = vmatpush3.bf16.msra.mxu0 %v945_v14 }
  0x11   :  { %671 = vmatpush3.bf16.msra.mxu1 %v951_v15  ;;  %650 = vmatprep.subr.bf16.mxu0 %v957_v16 }
  0x12   :  { %672 = vmatprep.subr.bf16.mxu1 %v963_v17 }
  0x14   :  { %651 = vmatpush3.bf16.msra.mxu0 %v969_v18 }
  0x15   :  { %673 = vmatpush3.bf16.msra.mxu1 %v975_v19  ;;  %652 = vmatprep.subr.bf16.mxu0 %v981_v20 }
  0x16   :  { %674 = vmatprep.subr.bf16.mxu1 %v987_v21 }
  0x18   :  { %653 = vmatpush3.bf16.msra.mxu0 %v993_v22 }
  0x19   :  { %675 = vmatpush3.bf16.msra.mxu1 %v999_v23  ;;  %654 = vmatprep.subr.bf16.mxu0 %v1005_v24 }
  0x1a   :  { %676 = vmatprep.subr.bf16.mxu1 %v1011_v25 }
  0x1c   :  { %655 = vmatpush3.bf16.msra.mxu0 %v1017_v26 }
  0x1d   :  { %677 = vmatpush3.bf16.msra.mxu1 %v1023_v27  ;;  %656 = vmatprep.subr.bf16.mxu0 %v1029_v28 }
  0x1e   :  { %678 = vmatprep.subr.bf16.mxu1 %v1035_v29 }
  0x20   :  { %657 = vmatpush3.bf16.msra.mxu0 %v1041_v30 }
  0x21   :  { %9 = vsyncpa [#allocation3], 0  ;;  %679 = vmatpush3.bf16.msra.mxu1 %v1047_v31  ;;  %v87_v34 = vcombine.high %v83_v32, %v83_v32  ;;  %v1057_v35 = vpack.c.bf16 %v83_v32, %v83_v32  ;;  %v88_v36 = vcombine.high %v84_v33, %v84_v33  ;;  %v1059_v37 = vpack.c.bf16 %v84_v33, %v84_v33  ;;  %s833_s7 = smov [#allocation2]  }
  0x22   :  { %686 = vmatprep.subr.bf16.mxu0 %v862_v0  ;;  %708 = vmatprep.subr.bf16.mxu1 %v867_v1  ;;  %s600_s8 = sshll.u32 %s833_s7, 4  ;;  %vm592_vm0 = vcmask 257024   ;;  %s601_s8 = int_to_ptr.vmem [resolvable:$true] %s600_s8 }
  0x23   :  { %v92_v38 = vpack.c.bf16 %v87_v34, %v87_v34  ;;  %v95_v39 = vunpack.c.l.bf16 %v1057_v35  ;;  %v94_v40 = vpack.c.bf16 %v88_v36, %v88_v36  ;;  %v97_v41 = vunpack.c.l.bf16 %v1059_v37  ;;  %s809_s9 = scalar_lea.vmem %s601_s8, 64  ;;  %p814_p1 = scmp.lt.s32.totalorder %s601_s8, %s601_s8 }
  0x24   :  { %p810_p0 = scmp.ne.s32.totalorder %s601_s8, %s809_s9  ;;  %p815_p2 = scmp.lt.s32.totalorder %s809_s9, %s809_s9 }
  0x25   :  { %v96_v42 = vunpack.c.l.bf16 %v92_v38  ;;  %v98_v43 = vunpack.c.l.bf16 %v94_v40 }
  0x26   :  { %p816_p3 = por %p815_p2, %p814_p1 }
  0x27   :  { %v103_v44 = vcombine.low %v95_v39, %v96_v42  ;;  %v104_v45 = vcombine.low %v97_v41, %v98_v43 }
  0x28   :  { %p817_p4 = pnand %p816_p3, %p810_p0 }
  0x29   :  { %v107_v46 = vsub.f32 %v83_v32, %v103_v44  ;;  %v108_v47 = vsub.f32 %v84_v33, %v104_v45 }
  0x2b   :  { %v111_v48 = vcombine.high %v107_v46, %v107_v46  ;;  %v112_v49 = vcombine.high %v108_v47, %v108_v47  ;;  %v115_v50 = vpack.c.bf16 %v107_v46, %v107_v46  ;;  %v117_v51 = vpack.c.bf16 %v108_v47, %v108_v47 }
  0x2d   :  { %v116_v52 = vpack.c.bf16 %v111_v48, %v111_v48  ;;  %v118_v53 = vpack.c.bf16 %v112_v49, %v112_v49  ;;  %v119_v56 = vunpack.c.l.bf16 %v115_v50  ;;  %v121_v57 = vunpack.c.l.bf16 %v117_v51 }
  0x2f   :  { %367 = vmatprep.mubr.bf16.mxu0 %v116_v52  ;;  %407 = vmatprep.mubr.bf16.mxu1 %v118_v53  ;;  %v120_v54 = vunpack.c.l.bf16 %v116_v52  ;;  %v122_v55 = vunpack.c.l.bf16 %v118_v53 }
  0x30   :  { %368 = vmatmul.mubr.bf16.vlgmr.msra.gmra.mrb[0].mxu0 %v115_v50  ;;  %408 = vmatmul.mubr.bf16.vlgmr.msra.gmra.mrb[0].mxu1 %v117_v51 }
  0x31   :  { %687 = vmatpush3.bf16.msra.mxu0 %v873_v2  ;;  %709 = vmatpush3.bf16.msra.mxu1 %v879_v3  ;;  %v127_v58 = vcombine.low %v119_v56, %v120_v54  ;;  %v128_v59 = vcombine.low %v121_v57, %v122_v55 }
  0x32   :  { %688 = vmatprep.subr.bf16.mxu0 %v885_v4  ;;  %710 = vmatprep.subr.bf16.mxu1 %v891_v5 }
  0x33   :  { %447 = vmatprep.mubr.bf16.mxu0 %v92_v38  ;;  %487 = vmatprep.mubr.bf16.mxu1 %v94_v40  ;;  %v131_v60 = vsub.f32 %v107_v46, %v127_v58  ;;  %v132_v61 = vsub.f32 %v108_v47, %v128_v59  ;;  %v640_v38 = vld [vmem:[%s1149_s2] ss:$0 sm:$0xff] }
  0x34   :  { %v641_v40 = vld [vmem:[%s1150_s3] ss:$0 sm:$0xff] }
  0x35   :  { %689 = vmatpush3.bf16.msra.mxu0 %v897_v6  ;;  %711 = vmatpush3.bf16.msra.mxu1 %v903_v7  ;;  %v135_v62 = vcombine.high %v131_v60, %v131_v60  ;;  %v136_v63 = vcombine.high %v132_v61, %v132_v61 }
  0x36   :  { %690 = vmatprep.subr.bf16.mxu0 %v909_v8  ;;  %712 = vmatprep.subr.bf16.mxu1 %v915_v9 }
  0x37   :  { %v140_v32 = vpack.c.bf16 %v135_v62, %v135_v62  ;;  %v142_v33 = vpack.c.bf16 %v136_v63, %v136_v63 }
  0x39   :  { %691 = vmatpush3.bf16.msra.mxu0 %v921_v10  ;;  %713 = vmatpush3.bf16.msra.mxu1 %v927_v11 }
  0x3a   :  { %692 = vmatprep.subr.bf16.mxu0 %v933_v12  ;;  %714 = vmatprep.subr.bf16.mxu1 %v939_v13 }
  0x3d   :  { %693 = vmatpush3.bf16.msra.mxu0 %v945_v14  ;;  %715 = vmatpush3.bf16.msra.mxu1 %v951_v15 }
  0x3e   :  { %694 = vmatprep.subr.bf16.mxu0 %v957_v16  ;;  %716 = vmatprep.subr.bf16.mxu1 %v963_v17 }
  0x41   :  { %695 = vmatpush3.bf16.msra.mxu0 %v969_v18  ;;  %717 = vmatpush3.bf16.msra.mxu1 %v975_v19 }
  0x42   :  { %696 = vmatprep.subr.bf16.mxu0 %v981_v20  ;;  %718 = vmatprep.subr.bf16.mxu1 %v987_v21 }
  0x45   :  { %697 = vmatpush3.bf16.msra.mxu0 %v993_v22  ;;  %719 = vmatpush3.bf16.msra.mxu1 %v999_v23 }
  0x46   :  { %698 = vmatprep.subr.bf16.mxu0 %v1005_v24  ;;  %720 = vmatprep.subr.bf16.mxu1 %v1011_v25 }
  0x49   :  { %699 = vmatpush3.bf16.msra.mxu0 %v1017_v26  ;;  %721 = vmatpush3.bf16.msra.mxu1 %v1023_v27 }
  0x4a   :  { %700 = vmatprep.subr.bf16.mxu0 %v1029_v28  ;;  %722 = vmatprep.subr.bf16.mxu1 %v1035_v29 }
  0x4d   :  { %701 = vmatpush3.bf16.msra.mxu0 %v1041_v30  ;;  %723 = vmatpush3.bf16.msra.mxu1 %v1047_v31 }
  0x4e   :  { %730 = vmatprep.subr.bf16.mxu0 %v862_v0  ;;  %752 = vmatprep.subr.bf16.mxu1 %v867_v1  ;;  %v139_v0 = vpack.c.bf16 %v131_v60, %v131_v60  ;;  %v141_v1 = vpack.c.bf16 %v132_v61, %v132_v61 }
  0x50   :  { %448 = vmatmul.mubr.bf16.vlgmr.msra.gmra.mrb[4].mxu0 %v1057_v35  ;;  %488 = vmatmul.mubr.bf16.vlgmr.msra.gmra.mrb[4].mxu1 %v1059_v37 }
  0x51   :  { %731 = vmatpush3.bf16.msra.mxu0 %v873_v2  ;;  %753 = vmatpush3.bf16.msra.mxu1 %v879_v3 }
  0x52   :  { %732 = vmatprep.subr.bf16.mxu0 %v885_v4  ;;  %754 = vmatprep.subr.bf16.mxu1 %v891_v5 }
  0x53   :  { %527 = vmatprep.mubr.bf16.mxu0 %v140_v32  ;;  %567 = vmatprep.mubr.bf16.mxu1 %v142_v33 }
  0x55   :  { %733 = vmatpush3.bf16.msra.mxu0 %v897_v6  ;;  %755 = vmatpush3.bf16.msra.mxu1 %v903_v7 }
  0x56   :  { %734 = vmatprep.subr.bf16.mxu0 %v909_v8  ;;  %756 = vmatprep.subr.bf16.mxu1 %v915_v9 }
  0x59   :  { %735 = vmatpush3.bf16.msra.mxu0 %v921_v10  ;;  %757 = vmatpush3.bf16.msra.mxu1 %v927_v11 }
  0x5a   :  { %736 = vmatprep.subr.bf16.mxu0 %v933_v12  ;;  %758 = vmatprep.subr.bf16.mxu1 %v939_v13 }
  0x5d   :  { %737 = vmatpush3.bf16.msra.mxu0 %v945_v14  ;;  %759 = vmatpush3.bf16.msra.mxu1 %v951_v15 }
  0x5e   :  { %738 = vmatprep.subr.bf16.mxu0 %v957_v16  ;;  %760 = vmatprep.subr.bf16.mxu1 %v963_v17 }
  0x61   :  { %739 = vmatpush3.bf16.msra.mxu0 %v969_v18  ;;  %761 = vmatpush3.bf16.msra.mxu1 %v975_v19 }
  0x62   :  { %740 = vmatprep.subr.bf16.mxu0 %v981_v20  ;;  %762 = vmatprep.subr.bf16.mxu1 %v987_v21 }
  0x65   :  { %741 = vmatpush3.bf16.msra.mxu0 %v993_v22  ;;  %763 = vmatpush3.bf16.msra.mxu1 %v999_v23 }
  0x66   :  { %742 = vmatprep.subr.bf16.mxu0 %v1005_v24  ;;  %764 = vmatprep.subr.bf16.mxu1 %v1011_v25 }
  0x69   :  { %743 = vmatpush3.bf16.msra.mxu0 %v1017_v26  ;;  %765 = vmatpush3.bf16.msra.mxu1 %v1023_v27 }
  0x6a   :  { %744 = vmatprep.subr.bf16.mxu0 %v1029_v28  ;;  %766 = vmatprep.subr.bf16.mxu1 %v1035_v29 }
  0x6d   :  { %745 = vmatpush3.bf16.msra.mxu0 %v1041_v30  ;;  %767 = vmatpush3.bf16.msra.mxu1 %v1047_v31 }
  0x70   :  { %528 = vmatmul.mubr.bf16.vlgmr.msra.gmra.mrb[8].mxu0 %v139_v0  ;;  %568 = vmatmul.mubr.bf16.vlgmr.msra.gmra.mrb[8].mxu1 %v141_v1 }
 0x103   :  { %v658_v2 = vpop.f32.mrb[0].mxu0  ;;  %v680_v3 = vpop.f32.mrb[0].mxu1 }
 0x104   :  { %v659_v4 = vpop.f32.mrb[1].mxu0  ;;  %v681_v5 = vpop.f32.mrb[1].mxu1 }
 0x105   :  { %v660_v6 = vadd.f32 %v659_v4, %v658_v2  ;;  %v682_v7 = vadd.f32 %v681_v5, %v680_v3  ;;  %v661_v8 = vpop.f32.mrb[2].mxu0  ;;  %v683_v9 = vpop.f32.mrb[2].mxu1 }
 0x106   :  { %v662_v10 = vpop.f32.mrb[3].mxu0  ;;  %v684_v11 = vpop.f32.mrb[3].mxu1 }
 0x107   :  { %v410_v12 = vadd.f32 %v682_v7, %v660_v6 }
 0x123   :  { %v702_v13 = vpop.f32.mrb[4].mxu0  ;;  %v724_v14 = vpop.f32.mrb[4].mxu1 }
 0x124   :  { %v703_v15 = vpop.f32.mrb[5].mxu0  ;;  %v725_v16 = vpop.f32.mrb[5].mxu1 }
 0x125   :  { %v704_v17 = vadd.f32 %v703_v15, %v702_v13  ;;  %v726_v18 = vadd.f32 %v725_v16, %v724_v14  ;;  %v705_v19 = vpop.f32.mrb[6].mxu0  ;;  %v727_v20 = vpop.f32.mrb[6].mxu1 }
 0x126   :  { %v706_v21 = vpop.f32.mrb[7].mxu0  ;;  %v728_v22 = vpop.f32.mrb[7].mxu1 }
 0x127   :  { %v450_v23 = vadd.f32 %v704_v17, %v410_v12 }
 0x129   :  { %v490_v24 = vadd.f32 %v726_v18, %v450_v23 }
 0x143   :  { %v746_v25 = vpop.f32.mrb[8].mxu0  ;;  %v768_v26 = vpop.f32.mrb[8].mxu1 }
 0x144   :  { %v747_v27 = vpop.f32.mrb[9].mxu0  ;;  %v769_v28 = vpop.f32.mrb[9].mxu1 }
 0x145   :  { %v748_v29 = vadd.f32 %v747_v27, %v746_v25  ;;  %v770_v30 = vadd.f32 %v769_v28, %v768_v26  ;;  %v749_v31 = vpop.f32.mrb[10].mxu0  ;;  %v771_v34 = vpop.f32.mrb[10].mxu1 }
 0x146   :  { %v750_v35 = vpop.f32.mrb[11].mxu0  ;;  %v772_v36 = vpop.f32.mrb[11].mxu1 }
 0x147   :  { %v570_v37 = vadd.f32 %v770_v30, %v748_v29 }
 0x149   :  { %v575_v39 = vadd.f32 %v570_v37, %v490_v24 }
 0x14b   :  { %v583_v41 = vmul.f32 %v640_v38, %v575_v39 }
 0x14d   :  { %v591_v42 = vadd.f32 %v641_v40, %v583_v41 }
 0x14f   :  { %593 = vst.msk [vmem:[#allocation2] sm:$0xf] %vm592_vm0, %v591_v42 }
 0x150   :  { %820 = shalt.err (!%p817_p4)
}
 0x151   :  { %s821_s11 = scalar_lea.hbm %s1151_s4, 64 }
 0x152   :  { %p822_p5 = scmp.ne.s32.totalorder %s1151_s4, %s821_s11  ;;  %p825_p6 = scmp.lt.u32.totalorder %s821_s11, %s1151_s4 }
 0x154   :  { %p827_p7 = pnand %p825_p6, %p822_p5 }
 0x156   :  { %830 = shalt.err (!%p827_p7)
}
 0x157   :  { %603 = dma.vmem_to_hbm [thread:$0]  %s601_s8, 64, %s1151_s4, [#allocation3]  }
 0x158   :  { %831 = dma.done.wait [#allocation3], 64  }
 0x159   :  { %832 = vsyncadd [#allocation3], 4294967232 }
 0x15a   :  { %607 = vsyncpa [#allocation3], 1 }

</bundles_post_ra>
